<compile_context>
chip_gen: v7x
topology: tpu7x:2x2x1
jax: 0.10.0
libtpu: 0.0.40
codegen_flags: <defaults>
</compile_context>

<pallas_src>
import jax
import jax.numpy as jnp
from jax.experimental import pallas as pl
from jax.experimental.pallas import tpu as pltpu


# ---------------------------------------------------------------------------
# Streaming FiLM kernel over the native (B, C, T) layout.
# ---------------------------------------------------------------------------
def _film_apply_kernel(gamma_ref, beta_ref, x_ref, o_ref):
    """gamma/beta: (1, C, 1) f32 (FiLM scale pre-folded); x/o: (1, C, T_tile)."""
    o_ref[...] = (gamma_ref[...] * x_ref[...] + beta_ref[...]).astype(o_ref.dtype)


def _tile_budget_bytes():
    """Per-block byte budget for the streamed T tiles, tuned per TPU generation."""
    try:
        kind = jax.devices()[0].device_kind.lower()
    except Exception:
        return 3 << 20
    if "v7" in kind:
        return 6 << 20   # ~3.2 TB/s HBM: amortize the ~0.35 us/step overhead
    if "v6" in kind:
        return 4 << 20
    return 3 << 20       # v5e & unknown: stay well under the 16 MiB scoped default


def _choose_t_tile(B, T, C, itemsize, target_bytes):
    """Largest lane-dense (multiple-of-128) T tile within the byte budget.

    Does NOT require the tile to divide T: the grid uses pl.cdiv and the last
    (ragged) block is masked by Pallas.
    """
    row_bytes = max(1, C * itemsize)
    t_cap = max(128, (target_bytes // row_bytes) // 128 * 128)
    t_full = -(-T // 128) * 128                 # T rounded up to lane width
    t_tile = min(t_cap, t_full)
    # Megacore (v7x) balance: prefer >= 2 grid steps over one monolithic tile.
    while B * (-(-T // t_tile)) < 2 and t_tile > 128:
        t_tile = max(128, (t_tile // 2) // 128 * 128)
    return t_tile


def latent_film(h, global_emb, params, *, donate_h=False, tile_budget_bytes=None):
    """h: (B, C, T), global_emb: (B, cond_dim) -> (B, C, T) (same dtype as h)."""
    B, C, T = h.shape

    # --- gamma/beta projection: tiny (B,K)@(K,2C) done by XLA (no extra
    #     pallas_call launch, no gamma/beta HBM round trip). FiLM scale folded.
    w_cat = jnp.concatenate(
        [params["gamma_w"], params["beta_w"]], axis=0).astype(jnp.float32)      # (2C, K)
    b_cat = jnp.concatenate(
        [params["gamma_b"], params["beta_b"]], axis=0).astype(jnp.float32)      # (2C,)
    gb = jnp.einsum("bk,ck->bc", global_emb.astype(jnp.float32), w_cat,
                    preferred_element_type=jnp.float32) + b_cat                  # (B, 2C)
    gb = (params["scale"].astype(jnp.float32) * 300.0) * jnp.tanh(gb * (1.0 / 300.0))
    gamma, beta = jnp.split(gb, 2, axis=-1)                                      # (B, C) x2
    gamma3 = gamma[..., None]     # (B, C, 1): C on sublanes, broadcasts over lanes
    beta3 = beta[..., None]

    # --- stream h in native (B, C, T) layout: T lane-dense, C on sublanes.
    itemsize = jnp.dtype(h.dtype).itemsize
    budget = _tile_budget_bytes() if tile_budget_bytes is None else tile_budget_bytes
    t_tile = _choose_t_tile(B, T, C, itemsize, budget)
    num_t = pl.cdiv(T, t_tile)

    block_bytes = C * t_tile * itemsize
    # 2x double-buffered input + 2x double-buffered output + tiny gamma/beta.
    vmem_limit = int(min(max(4 * block_bytes + (2 << 20), 16 << 20), 60 << 20))

    out = pl.pallas_call(
        _film_apply_kernel,
        out_shape=jax.ShapeDtypeStruct((B, C, T), h.dtype),
        grid=(B, num_t),
        in_specs=[
            pl.BlockSpec((1, C, 1), lambda b, t: (b, 0, 0)),        # gamma (scaled)
            pl.BlockSpec((1, C, 1), lambda b, t: (b, 0, 0)),        # beta  (scaled)
            pl.BlockSpec((1, C, t_tile), lambda b, t: (b, 0, t)),   # h tile
        ],
        out_specs=pl.BlockSpec((1, C, t_tile), lambda b, t: (b, 0, t)),
        compiler_params=pltpu.CompilerParams(
            dimension_semantics=("parallel", "parallel"),
            vmem_limit_bytes=vmem_limit),
        cost_estimate=pl.CostEstimate(
            flops=2 * B * C * T,
            transcendentals=0,
            bytes_accessed=2 * B * C * T * itemsize + 2 * B * C * 4),
        input_output_aliases=({2: 0} if donate_h else {}),
    )(gamma3, beta3, h)
    return out


# ---------------------------------------------------------------------------
# Pure-JAX reference mirroring the PyTorch forward (for the self-check).
# ---------------------------------------------------------------------------
def _reference(h, global_emb, params):
    x = jnp.transpose(h, (0, 2, 1))                                  # (B, T, C)
    gamma = global_emb @ params["gamma_w"].T + params["gamma_b"]     # (B, C)
    beta = global_emb @ params["beta_w"].T + params["beta_b"]
    gamma = 300.0 * jnp.tanh(gamma / 300.0)[:, None, :]
    beta = 300.0 * jnp.tanh(beta / 300.0)[:, None, :]
    out = params["scale"] * (gamma * x + beta)
    return jnp.transpose(out, (0, 2, 1))


def _init_params(key, dim, cond_dim, init_scale=0.05):
    """Deterministic init mimicking torch.nn.Linear default (U[-k, k])."""
    k = 1.0 / jnp.sqrt(jnp.float32(cond_dim))
    kg_w, kg_b, kb_w, kb_b = jax.random.split(key, 4)
    return {
        "gamma_w": jax.random.uniform(kg_w, (dim, cond_dim), jnp.float32, -k, k),
        "gamma_b": jax.random.uniform(kg_b, (dim,), jnp.float32, -k, k),
        "beta_w": jax.random.uniform(kb_w, (dim, cond_dim), jnp.float32, -k, k),
        "beta_b": jax.random.uniform(kb_b, (dim,), jnp.float32, -k, k),
        "scale": jnp.asarray(init_scale, jnp.float32),
    }


if __name__ == "__main__":
    key = jax.random.PRNGKey(0)
    k_h, k_c, k_p, k_h2 = jax.random.split(key, 4)

    # --- primary check: lane-aligned T, single tile per batch row.
    B, C, T, COND = 2, 32, 256, 16
    h = jax.random.normal(k_h, (B, C, T), jnp.float32)
    global_emb = jax.random.normal(k_c, (B, COND), jnp.float32)
    params = _init_params(k_p, dim=C, cond_dim=COND)

    out = jax.block_until_ready(latent_film(h, global_emb, params))
    ref = _reference(h, global_emb, params)
    assert out.shape == (B, C, T)
    assert jnp.allclose(out, ref, atol=1e-5, rtol=1e-5), "mismatch vs reference"

    # --- robustness check: ragged T with a tiny forced tile budget
    #     (multi-step grid + masked last block via pl.cdiv).
    T2 = 320
    h2 = jax.random.normal(k_h2, (B, C, T2), jnp.float32)
    out2 = jax.block_until_ready(
        latent_film(h2, global_emb, params, tile_budget_bytes=C * 128 * 4))
    ref2 = _reference(h2, global_emb, params)
    assert out2.shape == (B, C, T2)
    assert jnp.allclose(out2, ref2, atol=1e-5, rtol=1e-5), "ragged-T mismatch"

    print("KERNEL_OK")
</pallas_src>

<mosaic_0001>
module attributes {stable_mosaic.version = 11 : i64} {
  func.func @_film_apply_kernel(%arg0: i32, %arg1: i32, %arg2: memref<1x32x1xf32, #tpu.memory_space<vmem>>, %arg3: memref<1x32x1xf32, #tpu.memory_space<vmem>>, %arg4: memref<1x32x256xf32, #tpu.memory_space<vmem>>, %arg5: memref<1x32x256xf32, #tpu.memory_space<vmem>>) attributes {dimension_semantics = [#tpu.dimension_semantics<parallel>, #tpu.dimension_semantics<parallel>], iteration_bounds = array<i64: 2, 1>, scalar_prefetch = 0 : i64, scratch_operands = 0 : i64, tpu.core_type = #tpu.core_type<tc>, window_params = [{transform_indices = @transform_0, window_bounds = array<i64: 1, 32, 1>}, {transform_indices = @transform_1, window_bounds = array<i64: 1, 32, 1>}, {transform_indices = @transform_2, window_bounds = array<i64: 1, 32, 256>}, {transform_indices = @transform_3, window_bounds = array<i64: 1, 32, 256>}]} {
    %c0 = arith.constant 0 : index
    %c0_0 = arith.constant 0 : index
    %c0_1 = arith.constant 0 : index
    %0 = vector.load %arg2[%c0, %c0_0, %c0_1] : memref<1x32x1xf32, #tpu.memory_space<vmem>>, vector<1x32x1xf32>
    %c0_2 = arith.constant 0 : index
    %c0_3 = arith.constant 0 : index
    %c0_4 = arith.constant 0 : index
    %1 = vector.load %arg4[%c0_2, %c0_3, %c0_4] : memref<1x32x256xf32, #tpu.memory_space<vmem>>, vector<1x32x256xf32>
    %2 = vector.broadcast %0 : vector<1x32x1xf32> to vector<1x32x256xf32>
    %3 = arith.mulf %2, %1 : vector<1x32x256xf32>
    %c0_5 = arith.constant 0 : index
    %c0_6 = arith.constant 0 : index
    %c0_7 = arith.constant 0 : index
    %4 = vector.load %arg3[%c0_5, %c0_6, %c0_7] : memref<1x32x1xf32, #tpu.memory_space<vmem>>, vector<1x32x1xf32>
    %5 = vector.broadcast %4 : vector<1x32x1xf32> to vector<1x32x256xf32>
    %6 = arith.addf %3, %5 : vector<1x32x256xf32>
    %c0_8 = arith.constant 0 : index
    %c0_9 = arith.constant 0 : index
    %c0_10 = arith.constant 0 : index
    %7 = vector.load %arg5[%c0_8, %c0_9, %c0_10] : memref<1x32x256xf32, #tpu.memory_space<vmem>>, vector<1x32x256xf32>
    tpu.vector_store %arg5[%c0_8, %c0_9, %c0_10], %6 {strides = array<i32>} : memref<1x32x256xf32, #tpu.memory_space<vmem>>, vector<1x32x256xf32>,
    return
  }
  func.func @transform_0(%arg0: i32, %arg1: i32) -> (i32, i32, i32) {
    %c0_i32 = arith.constant 0 : i32
    %c0_i32_0 = arith.constant 0 : i32
    %c0_i32_1 = arith.constant 0 : i32
    return %arg0, %c0_i32, %c0_i32_0 : i32, i32, i32
  }
  func.func @transform_1(%arg0: i32, %arg1: i32) -> (i32, i32, i32) {
    %c0_i32 = arith.constant 0 : i32
    %c0_i32_0 = arith.constant 0 : i32
    %c0_i32_1 = arith.constant 0 : i32
    return %arg0, %c0_i32, %c0_i32_0 : i32, i32, i32
  }
  func.func @transform_2(%arg0: i32, %arg1: i32) -> (i32, i32, i32) {
    %c0_i32 = arith.constant 0 : i32
    %c0_i32_0 = arith.constant 0 : i32
    return %arg0, %c0_i32, %arg1 : i32, i32, i32
  }
  func.func @transform_3(%arg0: i32, %arg1: i32) -> (i32, i32, i32) {
    %c0_i32 = arith.constant 0 : i32
    %c0_i32_0 = arith.constant 0 : i32
    return %arg0, %c0_i32, %arg1 : i32, i32, i32
  }
}

</mosaic_0001>

<bundles_post_ra>
// kernel: tpu_custom_call.1
= control target key start
LH: loop header
LB: loop body
LE: loop exit
PB: predicated region body
PF: predicated region fallthrough
CT: control target
= control target key end

     0   :  { %8 = vsyncpa [#allocation3], 0  ;;  %s749_s0 = inlined_call_operand.vmem [shape: f32[2,32,1], index: 0, kind: input, shape index: {}]   ;;  %s750_s1 = inlined_call_operand.vmem [shape: f32[2,32,1], index: 1, kind: input, shape index: {}]   ;;  %s751_s2 = inlined_call_operand.vmem [shape: f32[2,32,256], index: 2, kind: input, shape index: {}]   ;;  %s752_s3 = inlined_call_operand.hbm [shape: f32[2,32,256], index: 3, kind: output, shape index: {}]  }
   0x1   :  { %10 = vsyncpa [#allocation3 + $0x1], 0  ;;  %s624_s12 = smov 0   ;;  %s626_s13 = smov 0  }
   0x2   :  { %s628_s14 = smov 0   ;;  %s630_s15 = smov 0  }
   0x3   :  { %s632_s16 = smov 0   ;;  %s634_s17 = smov 0  }
   0x4 LB: > { %s439_s18 = sadd.s32 4294967295, %s598_s17   ;;  %s440_s19 = sadd.s32 4294967294, %s598_s17   ;;  %s598_s17 = sphi %s634_s17, %s16_s17   ;;  %s594_s16 = sphi %s632_s16, %s759_s16   ;;  %s590_s15 = sphi %s630_s15, %s758_s15   ;;  %s586_s14 = sphi %s628_s14, %s757_s14   ;;  %s582_s13 = sphi %s626_s13, %s756_s13   ;;  %s578_s12 = sphi %s624_s12, %s755_s12  }
   0x5   : > { %s28_s20 = sadd.s32 1, %s594_s16  ;;  %s117_s21 = sadd.s32 1, %s586_s14 }
   0x6   : > { %p30_p0 = scmp.ge.s32.totalorder %s28_s20, 2  ;;  %p127_p1 = scmp.ne.s32.totalorder %s586_s14, %s582_s13 }
   0x7   : > { %p128_p2 = scmp.eq.s32.totalorder %s439_s18, 1  ;;  %p133_p3 = scmp.ne.s32.totalorder %s582_s13, %s578_s12 }
   0x8   : > { %s761_s20 = smov (%p30_p0, %s28_s20), 0  ;;  %p134_p5 = scmp.eq.s32.totalorder %s440_s19, 1 }
   0x9   : > { %p664_p4 = por %p128_p2, %p127_p1  ;;  %s112_s23 = ssub.s32 %s594_s16, %s761_s20 }
   0xa   : > { %p443_p6 = scmp.ge.s32.totalorder %s598_s17, 1  ;;  %p115_p7 = scmp.eq.s32.totalorder %s112_s23, 0 }
   0xb   : > { %p671_p8 = por %p134_p5, %p133_p3  ;;  %p181_p9 = scmp.lt.s32.totalorder %s598_s17, 3 }
   0xc   : > { %s677_s25 = scalar_select %p115_p7, %s586_s14, %s117_s21  }
   0xd   : > { %p182_p10 = pnand %p443_p6, %p181_p9 }
   0xe   : > { %p219_p11 = scmp.lt.s32.totalorder (!%p182_p10), %s590_s15, 1  ;;  %v600_v0 = vmov (!%p182_p10), 0   ;;  %s216_s11 = sand.u32 (!%p182_p10), 1, %s582_s13  }
   0xf   : > { %185 = sbr.rel (%p182_p10) target bundleno = 185 (0xb9), region = 32  ;;  %519 = vset.pattern.permute.xlu1 (!%p182_p10), %v600_v0  ;;  %518 = vset.pattern.permute.xlu0 (!%p182_p10), %v600_v0  ;;  %s444_s18 = sshll.u32 (!%p182_p10), %s216_s11, 6 }
  0x10   : > { %s459_s19 = sshll.u32 (!%p182_p10), %s590_s15, 10  ;;  %s218_s21 = scalar_lea.vmem (!%p182_p10), [#allocation2], %s444_s18 }
  0x11   : > { %s336_s23 = sshll.u32 (!%p182_p10), %s218_s21, 4  ;;  %s697_s28 = scalar_lea.hbm (!%p182_p10), %s752_s3, %s459_s19  ;;  %s699_s23 = int_to_ptr.vmem [resolvable:$true] %s336_s23 }
  0x12   : > { %s520_s29 = scalar_lea.vmem (!%p182_p10), %s699_s23, 1024 }
  0x13   : > { %p521_p12 = scmp.ne.s32.totalorder (!%p182_p10), %s699_s23, %s520_s29 }
  0x15   : > { %p522_p13 = pnand (!%p182_p10), %p521_p12, %p664_p4 }
  0x16   : > { %s220_s26 = scalar_select %p219_p11, %s590_s15, 1 }
  0x17   : > { %s703_s15 = scalar_lea.sflag [#allocation3], %s216_s11  ;;  %p523_p0 = pneg %p522_p13 }
  0x18   : > { %s456_s27 = sshll.u32 %s220_s26, 5  ;;  %s458_s7 = sshll.u32 %s220_s26, 6 }
  0x19   : > { %s223_s30 = scalar_lea.vmem %s749_s0, %s456_s27  ;;  %s228_s6 = scalar_lea.vmem %s750_s1, %s456_s27 }
  0x1a   : > { %v242_v1 = vld [vmem:[%s223_s30 + $0x10] sm:$0xff]  ;;  %v240_v2 = vld [vmem:[%s223_s30] sm:$0xff]  ;;  %v243_v3 = vld [vmem:[%s223_s30 + $0x18] sm:$0xff]  ;;  %s237_s10 = scalar_lea.vmem %s751_s2, %s458_s7 }
  0x1b   : > { %264 = vperm.xlu1 %519, %v242_v1   ;;  %254 = vperm.xlu0 %518, %v240_v2   ;;  %v241_v4 = vld [vmem:[%s223_s30 + $0x8] sm:$0xff]  ;;  %v280_v6 = vld [vmem:[%s228_s6] sm:$0xff]  ;;  %v283_v7 = vld [vmem:[%s228_s6 + $0x18] sm:$0xff]  ;;  %s601_s30 = smov [#allocation2]  }
  0x1c   : > { %v281_v5 = vld [vmem:[%s228_s6 + $0x8] sm:$0xff]  ;;  %v282_v8 = vld [vmem:[%s228_s6 + $0x10] sm:$0xff]  ;;  %v244_v11 = vld [vmem:[%s237_s10] sm:$0xff]  ;;  %s524_s4 = sshll.u32 %s601_s30, 4  ;;  %s525_s4 = int_to_ptr.vmem [resolvable:$false] %s524_s4 }
  0x1d   : > { %v245_v12 = vld [vmem:[%s237_s10 + $0x8] sm:$0xff]  ;;  %v246_v14 = vld [vmem:[%s237_s10 + $0x10] sm:$0xff]  ;;  %v247_v15 = vld [vmem:[%s237_s10 + $0x18] sm:$0xff]  ;;  %s526_s5 = scalar_lea.vmem %s525_s4, 2048  ;;  %p527_p1 = scmp.lt.s32.totalorder %s699_s23, %s525_s4 }
  0x1e   : > { %v248_v17 = vld [vmem:[%s237_s10 + $0x20] sm:$0xff]  ;;  %v249_v22 = vld [vmem:[%s237_s10 + $0x28] sm:$0xff]  ;;  %v250_v23 = vld [vmem:[%s237_s10 + $0x30] sm:$0xff]  ;;  %p528_p2 = scmp.lt.s32.totalorder %s526_s5, %s520_s29 }
  0x1f   : > { %269 = vperm.xlu1 %519, %v243_v3   ;;  %259 = vperm.xlu0 %518, %v241_v4   ;;  %v251_v24 = vld [vmem:[%s237_s10 + $0x38] sm:$0xff] }
  0x20   : > { %p529_p3 = por %p528_p2, %p527_p1 }
  0x22   : > { %p530_p5 = pnand %p529_p3, %p523_p0 }
  0x23   : > { %291 = vperm.xlu1 %519, %v281_v5   ;;  %286 = vperm.xlu0 %518, %v280_v6  }
  0x27   : > { %301 = vperm.xlu1 %519, %v283_v7   ;;  %296 = vperm.xlu0 %518, %v282_v8  }
  0x9a   : > { %v265_v9 = vpop.permute.xlu1 %264  ;;  %v255_v10 = vpop.permute.xlu0 %254 }
  0x9b   : > { %v272_v18 = vmul.f32 %v255_v10, %v244_v11  ;;  %v273_v19 = vmul.f32 %v255_v10, %v245_v12  ;;  %v276_v31 = vmul.f32 %v265_v9, %v248_v17  ;;  %v277_v32 = vmul.f32 %v265_v9, %v249_v22 }
  0x9e   : > { %v270_v13 = vpop.permute.xlu1 %269  ;;  %v260_v16 = vpop.permute.xlu0 %259 }
  0x9f   : > { %v274_v20 = vmul.f32 %v260_v16, %v246_v14  ;;  %v275_v21 = vmul.f32 %v260_v16, %v247_v15  ;;  %v278_v33 = vmul.f32 %v270_v13, %v250_v23  ;;  %v279_v34 = vmul.f32 %v270_v13, %v251_v24 }
  0xa2   : > { %v292_v25 = vpop.permute.xlu1 %291  ;;  %v287_v26 = vpop.permute.xlu0 %286 }
  0xa3   : > { %v306_v27 = vadd.f32 %v292_v25, %v274_v20  ;;  %v307_v28 = vadd.f32 %v292_v25, %v275_v21  ;;  %v304_v29 = vadd.f32 %v287_v26, %v272_v18  ;;  %v305_v30 = vadd.f32 %v287_v26, %v273_v19 }
  0xa5   : > { %314 = vst [vmem:[%s218_s21 + $0x10] sm:$0xff] %v306_v27  ;;  %315 = vst [vmem:[%s218_s21 + $0x18] sm:$0xff] %v307_v28 }
  0xa6   : > { %312 = vst [vmem:[%s218_s21] sm:$0xff] %v304_v29  ;;  %313 = vst [vmem:[%s218_s21 + $0x8] sm:$0xff] %v305_v30  ;;  %v302_v35 = vpop.permute.xlu1 %301  ;;  %v297_v36 = vpop.permute.xlu0 %296 }
  0xa7   : > { %v310_v37 = vadd.f32 %v302_v35, %v278_v33  ;;  %v311_v38 = vadd.f32 %v302_v35, %v279_v34  ;;  %v308_v39 = vadd.f32 %v297_v36, %v276_v31  ;;  %v309_v40 = vadd.f32 %v297_v36, %v277_v32 }
  0xa9   : > { %318 = vst [vmem:[%s218_s21 + $0x30] sm:$0xff] %v310_v37  ;;  %319 = vst [vmem:[%s218_s21 + $0x38] sm:$0xff] %v311_v38 }
  0xaa   : > { %316 = vst [vmem:[%s218_s21 + $0x20] sm:$0xff] %v308_v39  ;;  %317 = vst [vmem:[%s218_s21 + $0x28] sm:$0xff] %v309_v40 }
  0xab   : > { %533 = shalt.err (!%p530_p5)
}
  0xac   : > { %s534_s6 = scalar_lea.hbm %s697_s28, 1024  ;;  %s538_s9 = scalar_lea.hbm %s752_s3, 2048 }
  0xad   : > { %p535_p6 = scmp.ne.s32.totalorder %s697_s28, %s534_s6  ;;  %p539_p10 = scmp.lt.u32.totalorder %s697_s28, %s752_s3 }
  0xae   : > { %p540_p11 = scmp.lt.u32.totalorder %s538_s9, %s534_s6  ;;  %p542_p13 = scmp.lt.u32.totalorder %s534_s6, %s697_s28 }
  0xaf   : > { %p536_p7 = pnand %p535_p6, %p664_p4 }
  0xb0   : > { %p541_p12 = por %p540_p11, %p539_p10 }
  0xb1   : > { %p537_p9 = pneg %p536_p7 }
  0xb2   : > { %p543_p0 = por %p542_p13, %p541_p12 }
  0xb4   : > { %p544_p1 = pnand %p543_p0, %p537_p9 }
  0xb6   : > { %547 = shalt.err (!%p544_p1)
}
  0xb7   : > { %s602_s18 = smov 256   ;;  %s603_s19 = smov 16  }
  0xb8   : > { %460 = dma.vmem_to_hbm [thread:$0]  (%p664_p4), %s699_s23, 1024, %s697_s28, %s703_s15, %s602_s18, %s602_s18, %s603_s19  }
  0xb9 PF: > { %p466_p2 = scmp.ge.s32.totalorder %s598_s17, 2  ;;  %s351_s21 = sand.u32 1, %s578_s12  }
  0xba   : > { %s352_s26 = scalar_lea.sflag [#allocation3], %s351_s21 }
  0xbb   : > { %p463_p3 = pnand %p466_p2, %p671_p8 }
  0xbd   : > { %573 = dma.done.wait (!%p463_p3), %s352_s26, 1024  }
  0xbe   : > { %575 = vsyncadd (!%p463_p3), %s352_s26, 4294966272  ;;  %s16_s17 = sadd.s32 1, %s598_s17   ;;  %s755_s12 = smov %s582_s13 }
  0xbf   : > { %p13_p5 = scmp.ge.s32.totalorder %s16_s17, 4   ;;  %s756_s13 = smov %s586_s14 }
  0xc0   : > { %s757_s14 = smov %s677_s25  ;;  %s758_s15 = smov %s594_s16 }
  0xc1   : > { %s759_s16 = smov %s761_s20  ;;  %15 = sbr.rel (!%p13_p5) target bundleno = 4 (0x4), region = 73 }
  0xc8   :  { %357 = vsyncpa [#allocation3], 1 }
  0xc9   :  { %359 = vsyncpa [#allocation3 + $0x1], 1 }

</bundles_post_ra>
